<compile_context>
chip_gen: v5e
topology: v5e:2x2
jax: 0.10.0
libtpu: 0.0.40
codegen_flags: <defaults>
</compile_context>

<pallas_src>
import functools

import jax
import jax.numpy as jnp
from jax.experimental import pallas as pl
from jax.experimental.pallas import tpu as pltpu

HID = 40            # hidden width
K_EXT = 48          # layer-2 contraction dim incl. folded-bias row, padded to x8
PACK_ROWS = 48      # slab rows (multiple of 8)
PACK_COLS = 128     # slab cols (one lane tile)
LANES = 128
TN_MAX = 8192       # max batch-lane tile (intermediates ~2.8 MiB, far under VMEM)

# Slab column layout:
#   cols 0..47 : W2_ext -- rows 0..39: [W2 | b2 | 0...0]  (col 40 == b2)
#   col  48    : W1[:, 0] extended to 48 rows (rows 40..47 zero)
#   col  49    : b1 extended to 48 rows, row 40 == 1.0 (makes the ones-row)
#   col  50    : W3[0, :] (rows 0..39)
#   col  51    : b3 (row 0)
COL_W1 = 48
COL_B1 = 49
COL_W3 = 50
COL_B3 = 51


def _mlp_kernel(x_ref, p_ref, o_ref, *, use_bf16=False):
    x = x_ref[...]                                   # (1, TN), batch along lanes

    w1c = p_ref[0:K_EXT, COL_W1:COL_W1 + 1]          # (48, 1)  rows 40..47 are 0
    b1c = p_ref[0:K_EXT, COL_B1:COL_B1 + 1]          # (48, 1)  row 40 == 1.0
    w2e = p_ref[0:HID, 0:K_EXT]                      # (40, 48) col 40 == b2
    w3c = p_ref[0:HID, COL_W3:COL_W3 + 1]            # (40, 1)
    b3 = p_ref[0:1, COL_B3:COL_B3 + 1]               # (1, 1)

    # Layer 1 (in_features = 1): outer product on the VPU.  Row 40 evaluates to
    # relu(0*x + 1) == 1 -> the constant row that carries b2 through the MXU.
    h1 = jnp.maximum(w1c * x + b1c, 0.0)             # (48, TN)

    # Layer 2 (40x48, bias folded): the only MXU matmul in the kernel.
    if use_bf16:
        h2 = jnp.dot(w2e.astype(jnp.bfloat16), h1.astype(jnp.bfloat16),
                     preferred_element_type=jnp.float32)
    else:
        h2 = jnp.dot(w2e, h1, preferred_element_type=jnp.float32)
    h2 = jnp.maximum(h2, 0.0)                        # (40, TN)

    # Layer 3 (out_features = 1): VPU multiply + XLU sublane reduction.
    y = jnp.sum(w3c * h2, axis=0, keepdims=True) + b3    # (1, TN)

    o_ref[...] = y.astype(o_ref.dtype)               # lane-dense store


def pack_params(params):
    """Pack PyTorch-convention params into one (48, 128) f32 slab.

    Call ONCE per parameter set (e.g. once per MAML inner-loop update), not per
    forward call.
    """
    slab = jnp.zeros((PACK_ROWS, PACK_COLS), jnp.float32)
    slab = slab.at[:HID, :HID].set(params["w2"].astype(jnp.float32))     # W2
    slab = slab.at[:HID, HID].set(params["b2"].astype(jnp.float32))      # b2 -> col 40
    slab = slab.at[:HID, COL_W1].set(params["w1"][:, 0].astype(jnp.float32))
    slab = slab.at[:HID, COL_B1].set(params["b1"].astype(jnp.float32))
    slab = slab.at[HID, COL_B1].set(1.0)             # ones-row generator for folded b2
    slab = slab.at[:HID, COL_W3].set(params["w3"][0, :].astype(jnp.float32))
    slab = slab.at[0, COL_B3].set(params["b3"][0].astype(jnp.float32))
    return slab


def _pick_tiling(n):
    """Return (n_pad, tile_lanes, steps) for a batch of n samples."""
    n_lanes = pl.cdiv(n, LANES) * LANES
    if n_lanes <= 2 * LANES:
        # Tiny (K-shot) batch: one block, zero grid overhead.
        return n_lanes, n_lanes, 1
    # Mid/large batch: >=2 steps (even count so both v7x TCs engage), each <= TN_MAX.
    steps = max(2, pl.cdiv(n_lanes, TN_MAX))
    if steps % 2:
        steps += 1
    tn = pl.cdiv(n_lanes, steps * LANES) * LANES
    return steps * tn, tn, steps


def _cost(n_pad, tasks=1):
    flops = (2 * HID * K_EXT + 7 * HID + 4) * n_pad * tasks
    bytes_accessed = (8 * n_pad + PACK_ROWS * PACK_COLS * 4) * tasks
    return pl.CostEstimate(flops=flops, transcendentals=0,
                           bytes_accessed=bytes_accessed)


def maml_forward(x, packed_params, *, use_bf16=False):
    """x: (N, 1) float32.  packed_params: (48, 128) slab from pack_params()."""
    n = x.shape[0]
    n_pad, tn, steps = _pick_tiling(n)

    # Batch -> lane axis; (N,1)->(1,N) is a free reshape (no transpose).
    x_row = x.reshape(1, n)
    if n_pad != n:
        x_row = jnp.pad(x_row, ((0, 0), (0, n_pad - n)))
    # TODO(synk): pass n as an SMEM scalar and mask the final store in-kernel to
    # drop the wrapper-side pad/slice entirely for the K-shot path.

    out = pl.pallas_call(
        functools.partial(_mlp_kernel, use_bf16=use_bf16),
        out_shape=jax.ShapeDtypeStruct((1, n_pad), jnp.float32),
        grid=(steps,),
        in_specs=[
            pl.BlockSpec((1, tn), lambda i: (0, i)),                 # x lane tile
            pl.BlockSpec((PACK_ROWS, PACK_COLS), lambda i: (0, 0)),  # params slab
        ],
        out_specs=pl.BlockSpec((1, tn), lambda i: (0, i)),
        compiler_params=pltpu.CompilerParams(
            dimension_semantics=("parallel",),
            vmem_limit_bytes=32 * 1024 * 1024),      # guard for v5e's 16 MiB default
        cost_estimate=_cost(n_pad),
    )(x_row, packed_params)

    return out[:, :n].reshape(n, 1)


def maml_forward_multitask(x_tasks, packed_tasks, *, use_bf16=False):
    """Fused forward over T tasks (one pallas_call, task axis on the grid).

    x_tasks: (T, N, 1) float32.  packed_tasks: (T, 48, 128) stacked slabs.
    Intended for K-shot MAML where N is small (a single lane tile per task).
    """
    t, n, _ = x_tasks.shape
    n_lanes = pl.cdiv(n, LANES) * LANES

    x_rows = x_tasks.reshape(t, 1, n)
    if n_lanes != n:
        x_rows = jnp.pad(x_rows, ((0, 0), (0, 0), (0, n_lanes - n)))

    out = pl.pallas_call(
        functools.partial(_mlp_kernel, use_bf16=use_bf16),
        out_shape=jax.ShapeDtypeStruct((t, 1, n_lanes), jnp.float32),
        grid=(t,),
        in_specs=[
            pl.BlockSpec((None, 1, n_lanes), lambda i: (i, 0, 0)),            # task x
            pl.BlockSpec((None, PACK_ROWS, PACK_COLS), lambda i: (i, 0, 0)),  # task slab
        ],
        out_specs=pl.BlockSpec((None, 1, n_lanes), lambda i: (i, 0, 0)),
        compiler_params=pltpu.CompilerParams(
            dimension_semantics=("parallel",),
            vmem_limit_bytes=32 * 1024 * 1024),
        cost_estimate=_cost(n_lanes, tasks=t),
    )(x_rows, packed_tasks)

    # TODO(synk): block-diagonal-pack 6 tasks' W2 (6*40=240<=256) into a single
    # MXU operand with their h1 blocks stacked on sublanes to fill the 256-wide
    # v6e/v7x MXU (~94% utilization vs ~16% for a lone 40x40 matmul).
    return out[:, :, :n].reshape(t, n, 1)


def _init_params(key):
    """Deterministic parameter init matching nn.Linear shapes (out, in)."""
    ks = jax.random.split(key, 6)

    def lin(kw, kb, fan_in, fan_out):
        bound = 1.0 / jnp.sqrt(fan_in)
        w = jax.random.uniform(kw, (fan_out, fan_in), jnp.float32, -bound, bound)
        b = jax.random.uniform(kb, (fan_out,), jnp.float32, -bound, bound)
        return w, b

    w1, b1 = lin(ks[0], ks[1], 1, 40)
    w2, b2 = lin(ks[2], ks[3], 40, 40)
    w3, b3 = lin(ks[4], ks[5], 40, 1)
    return {"w1": w1, "b1": b1, "w2": w2, "b2": b2, "w3": w3, "b3": b3}


def _reference(x, p):
    h1 = jnp.maximum(x @ p["w1"].T + p["b1"], 0.0)
    h2 = jnp.maximum(h1 @ p["w2"].T + p["b2"], 0.0)
    return h2 @ p["w3"].T + p["b3"]


if __name__ == "__main__":
    key = jax.random.PRNGKey(0)
    k_param, k_x, k_big, k_tasks = jax.random.split(key, 4)
    params = _init_params(k_param)
    packed = pack_params(params)   # hoisted out of the call path (done once)

    # --- single-task, K-shot sized batch (single-block path) ---
    x = jax.random.normal(k_x, (8, 1), jnp.float32)
    out = jax.block_until_ready(maml_forward(x, packed))
    ref = _reference(x, params)
    assert out.shape == (8, 1)
    assert jnp.allclose(out, ref, atol=1e-5, rtol=1e-5), "small-batch mismatch"

    # --- single-task, larger batch (multi-step grid path, >=2 even steps) ---
    xb = jax.random.normal(k_big, (1000, 1), jnp.float32)
    outb = jax.block_until_ready(maml_forward(xb, packed))
    refb = _reference(xb, params)
    assert outb.shape == (1000, 1)
    assert jnp.allclose(outb, refb, atol=1e-5, rtol=1e-5), "large-batch mismatch"

    # --- fused multi-task forward (per-task slab selected on the grid) ---
    T, N = 3, 8
    tks = jax.random.split(k_tasks, T + 1)
    task_params = [_init_params(tks[i]) for i in range(T)]
    packed_tasks = jnp.stack([pack_params(p) for p in task_params])
    x_tasks = jax.random.normal(tks[T], (T, N, 1), jnp.float32)
    out_mt = jax.block_until_ready(maml_forward_multitask(x_tasks, packed_tasks))
    assert out_mt.shape == (T, N, 1)
    for i in range(T):
        ref_i = _reference(x_tasks[i], task_params[i])
        assert jnp.allclose(out_mt[i], ref_i, atol=1e-5, rtol=1e-5), f"task {i} mismatch"

    print("KERNEL_OK")
</pallas_src>

<mosaic_0001>
module attributes {stable_mosaic.version = 11 : i64} {
  func.func @_mlp_kernel(%arg0: i32, %arg1: memref<1x128xf32, #tpu.memory_space<vmem>>, %arg2: memref<48x128xf32, #tpu.memory_space<vmem>>, %arg3: memref<1x128xf32, #tpu.memory_space<vmem>>) attributes {dimension_semantics = [#tpu.dimension_semantics<parallel>], iteration_bounds = array<i64: 1>, scalar_prefetch = 0 : i64, scratch_operands = 0 : i64, tpu.core_type = #tpu.core_type<tc>, window_params = [{transform_indices = @transform_0, window_bounds = array<i64: 1, 128>}, {pipeline_mode = #tpu.pipeline_mode<synchronous>, transform_indices = @transform_1, window_bounds = array<i64: 48, 128>}, {transform_indices = @transform_2, window_bounds = array<i64: 1, 128>}]} {
    %c0 = arith.constant 0 : index
    %c0_0 = arith.constant 0 : index
    %0 = vector.load %arg1[%c0, %c0_0] : memref<1x128xf32, #tpu.memory_space<vmem>>, vector<1x128xf32>
    %c0_1 = arith.constant 0 : index
    %c48 = arith.constant 48 : index
    %1 = vector.load %arg2[%c0_1, %c48] : memref<48x128xf32, #tpu.memory_space<vmem>>, vector<48x1xf32>
    %c0_2 = arith.constant 0 : index
    %c49 = arith.constant 49 : index
    %2 = vector.load %arg2[%c0_2, %c49] : memref<48x128xf32, #tpu.memory_space<vmem>>, vector<48x1xf32>
    %c0_3 = arith.constant 0 : index
    %c0_4 = arith.constant 0 : index
    %3 = vector.load %arg2[%c0_3, %c0_4] : memref<48x128xf32, #tpu.memory_space<vmem>>, vector<40x48xf32>
    %c0_5 = arith.constant 0 : index
    %c50 = arith.constant 50 : index
    %4 = vector.load %arg2[%c0_5, %c50] : memref<48x128xf32, #tpu.memory_space<vmem>>, vector<40x1xf32>
    %c0_6 = arith.constant 0 : index
    %c51 = arith.constant 51 : index
    %5 = vector.load %arg2[%c0_6, %c51] : memref<48x128xf32, #tpu.memory_space<vmem>>, vector<1x1xf32>
    %6 = vector.broadcast %1 : vector<48x1xf32> to vector<48x128xf32>
    %7 = vector.broadcast %0 : vector<1x128xf32> to vector<48x128xf32>
    %8 = arith.mulf %6, %7 : vector<48x128xf32>
    %9 = vector.broadcast %2 : vector<48x1xf32> to vector<48x128xf32>
    %10 = arith.addf %8, %9 : vector<48x128xf32>
    %cst = arith.constant 0.000000e+00 : f32
    %11 = vector.broadcast %cst : f32 to vector<48x128xf32>
    %12 = arith.maximumf %10, %11 : vector<48x128xf32>
    %cst_7 = arith.constant dense<0.000000e+00> : vector<40x128xf32>
    %13 = tpu.matmul %3, %12, %cst_7 {dimension_numbers = #tpu.dot_dimension_numbers<[1], [0], [0], [1], [0, 0, 1, 1], [], []>} : vector<40x48xf32>, vector<48x128xf32>, vector<40x128xf32> -> vector<40x128xf32>
    %cst_8 = arith.constant 0.000000e+00 : f32
    %14 = vector.broadcast %cst_8 : f32 to vector<40x128xf32>
    %15 = arith.maximumf %13, %14 : vector<40x128xf32>
    %16 = vector.broadcast %4 : vector<40x1xf32> to vector<40x128xf32>
    %17 = arith.mulf %16, %15 : vector<40x128xf32>
    %cst_9 = arith.constant dense<0.000000e+00> : vector<128xf32>
    %18 = vector.multi_reduction <add>, %17, %cst_9 [0] : vector<40x128xf32> to vector<128xf32>
    %19 = vector.shape_cast %18 : vector<128xf32> to vector<1x128xf32>
    %20 = vector.broadcast %5 : vector<1x1xf32> to vector<1x128xf32>
    %21 = arith.addf %19, %20 : vector<1x128xf32>
    %c0_10 = arith.constant 0 : index
    %c0_11 = arith.constant 0 : index
    %22 = vector.load %arg3[%c0_10, %c0_11] : memref<1x128xf32, #tpu.memory_space<vmem>>, vector<1x128xf32>
    tpu.vector_store %arg3[%c0_10, %c0_11], %21 {strides = array<i32>} : memref<1x128xf32, #tpu.memory_space<vmem>>, vector<1x128xf32>,
    return
  }
  func.func @transform_0(%arg0: i32) -> (i32, i32) {
    %c0_i32 = arith.constant 0 : i32
    %c0_i32_0 = arith.constant 0 : i32
    return %c0_i32, %arg0 : i32, i32
  }
  func.func @transform_1(%arg0: i32) -> (i32, i32) {
    %c0_i32 = arith.constant 0 : i32
    %c0_i32_0 = arith.constant 0 : i32
    %c0_i32_1 = arith.constant 0 : i32
    return %c0_i32, %c0_i32_0 : i32, i32
  }
  func.func @transform_2(%arg0: i32) -> (i32, i32) {
    %c0_i32 = arith.constant 0 : i32
    %c0_i32_0 = arith.constant 0 : i32
    return %c0_i32, %arg0 : i32, i32
  }
}

</mosaic_0001>

<bundles_post_ra>
// kernel: tpu_custom_call.1
= control target key start
LH: loop header
LB: loop body
LE: loop exit
PB: predicated region body
PF: predicated region fallthrough
CT: control target
= control target key end

     0   :  { %7 = vsyncpa [#allocation3], 0  ;;  %s429_s0 = inlined_call_operand.hbm [shape: f32[1,128], index: 0, kind: input, shape index: {}]   ;;  %s430_s1 = inlined_call_operand.hbm [shape: f32[48,128], index: 1, kind: input, shape index: {}]   ;;  %s431_s2 = inlined_call_operand.hbm [shape: f32[1,128], index: 2, kind: output, shape index: {}]  }
   0x1   :  { %8 = vsyncpa [#allocation6], 0 }
   0x2   :  { %9 = vsyncpa [#allocation4], 0  ;;  %s15_s11 = sshll.u32 %s429_s0, 4  ;;  %s366_s12 = smov [#allocation2]   ;;  %s16_s11 = int_to_ptr.hbm [resolvable:$true] %s15_s11 }
   0x3   :  { %s17_s13 = sshll.u32 %s366_s12, 4  ;;  %s25_s16 = sshll.u32 %s430_s1, 4  ;;  %s18_s13 = int_to_ptr.vmem [resolvable:$true] %s17_s13  ;;  %s26_s16 = int_to_ptr.hbm [resolvable:$true] %s25_s16 }
   0x4   :  { %20 = dma.hbm_to_vmem [thread:$0]  %s16_s11, 16, %s18_s13, [#allocation3]  }
   0x5   :  { %s367_s17 = smov [#allocation5]   ;;  %s368_s19 = smov 128  }
   0x6   :  { %s27_s18 = sshll.u32 %s367_s17, 4  ;;  %s369_s20 = smov 8   ;;  %s28_s18 = int_to_ptr.vmem [resolvable:$true] %s27_s18 }
   0x7   :  { %33 = dma.hbm_to_vmem [thread:$0]  %s26_s16, 768, %s28_s18, [#allocation6], %s368_s19, %s368_s19, %s369_s20  }
   0x8   :  { %360 = dma.done.wait [#allocation3], 16  }
   0x9   :  { %361 = vsyncadd [#allocation3], 4294967280 }
   0xa   :  { %362 = dma.done.wait [#allocation6], 768  }
   0xb   :  { %363 = vsyncadd [#allocation6], 4294966528  ;;  %v370_v0 = vmov 49   ;;  %v371_v1 = vmov 48   ;;  %v48_v2 = vld [vmem:[#allocation5 + $0x28] sm:$0xff]  ;;  %v396_v3 = vld [vmem:[#allocation5 + $0x20] sm:$0xff] }
   0xc   :  { %276 = vset.pattern.permute.xlu1 %v370_v0  ;;  %275 = vset.pattern.permute.xlu0 %v371_v1  ;;  %v399_v4 = vld [vmem:[#allocation5 + $0x18] sm:$0xff]  ;;  %v401_v5 = vld [vmem:[#allocation5 + $0x10] sm:$0xff]  ;;  %v406_v6 = vld [vmem:[#allocation5 + $0x8] sm:$0xff]  ;;  %v372_v15 = vmov 50   ;;  %v373_v23 = vmov 51   ;;  %vm130_vm0 = vcmask 392192  }
   0xd   :  { %278 = vset.pattern.permute.xlu2 %v370_v0  ;;  %115 = vperm.xlu1 %276, %v48_v2   ;;  %v411_v7 = vld [vmem:[#allocation5] sm:$0xff]  ;;  %v287_v9 = vld [vmem:[#allocation2] ss:$0 sm:$0xff]  ;;  %s374_s0 = smov [#allocation7]   ;;  %s232_s23 = sshll.u32 %s431_s2, 4  ;;  %s233_s23 = int_to_ptr.hbm [resolvable:$true] %s232_s23 }
   0xe   :  { %82 = vperm.xlu0 %275, %v48_v2   ;;  %111 = vperm.xlu2 %278, %v396_v3   ;;  %v54_v37 = vld [vmem:[#allocation5] sm:$0x1]  ;;  %s230_s1 = sshll.u32 %s374_s0, 4  ;;  %s231_s1 = int_to_ptr.vmem [resolvable:$true] %s230_s1 }
  0x15   :  { %277 = vset.pattern.permute.xlu1 %v371_v1 }
  0x16   :  { %77 = vperm.xlu0 %275, %v396_v3   ;;  %72 = vperm.xlu1 %277, %v399_v4  }
  0x17   :  { %279 = vset.pattern.permute.xlu2 %v371_v1 }
  0x18   :  { %67 = vperm.xlu2 %279, %v401_v5  }
  0x1e   :  { %280 = vset.pattern.permute.xlu0 %v370_v0  ;;  %62 = vperm.xlu1 %277, %v406_v6  }
  0x1f   :  { %107 = vperm.xlu0 %280, %v399_v4  }
  0x20   :  { %281 = vset.pattern.permute.xlu2 %v370_v0 }
  0x21   :  { %103 = vperm.xlu2 %281, %v401_v5  }
  0x26   :  { %57 = vperm.xlu1 %277, %v411_v7  }
  0x27   :  { %95 = vperm.xlu0 %280, %v411_v7  }
  0x29   :  { %99 = vperm.xlu2 %281, %v406_v6  }
  0x2e   :  { %282 = vset.pattern.permute.xlu1 %v372_v15 }
  0x2f   :  { %284 = vset.pattern.permute.xlu0 %v372_v15  ;;  %184 = vperm.xlu1 %282, %v411_v7  }
  0x30   :  { %192 = vperm.xlu0 %284, %v401_v5  }
  0x31   :  { %283 = vset.pattern.permute.xlu2 %v372_v15 }
  0x32   :  { %188 = vperm.xlu2 %283, %v406_v6  }
  0x37   :  { %196 = vperm.xlu1 %282, %v399_v4  }
  0x38   :  { %286 = vset.pattern.permute.xlu0 %v373_v23 }
  0x3a   :  { %200 = vperm.xlu2 %283, %v396_v3  }
  0x3f   :  { %285 = vset.pattern.permute.xlu1 %v373_v23 }
  0x40   :  { %220 = vperm.xlu1 %285, %v54_v37  }
  0x68   :  { %v112_v8 = vpop.permute.xlu2 %111 }
  0x72   :  { %v68_v10 = vpop.permute.xlu2 %67 }
  0x73   :  { %v90_v24 = vmul.f32 %v287_v9, %v68_v10 }
  0x7b   :  { %v104_v20 = vpop.permute.xlu2 %103 }
  0x7c   :  { %v120_v28 = vadd.f32 %v104_v20, %v90_v24 }
  0x7e   :  { %v126_v34 = vmax.f32 %v120_v28, 0.0 }
  0x7f   :  { %v116_v11 = vpop.permute.xlu1 %115 }
  0x80   :  { %v83_v12 = vpop.permute.xlu0 %82 }
  0x81   :  { %v93_v13 = vmul.f32 %v287_v9, %v83_v12 }
  0x83   :  { %v123_v14 = vadd.f32 %v116_v11, %v93_v13  ;;  %v100_v31 = vpop.permute.xlu2 %99 }
  0x85   :  { %v129_v16 = vmax.f32 %v123_v14, 0.0 }
  0x87   :  { %156 = vmatpush.msra.mxu0 %v129_v16  ;;  %248 = vmatpush.msra.mxu1 %v129_v16 }
  0x88   :  { %249 = vmatpush.msra.mxu2 %v129_v16  ;;  %250 = vmatpush.msra.mxu3 %v129_v16  ;;  %v78_v17 = vpop.permute.xlu0 %77  ;;  %v73_v19 = vpop.permute.xlu1 %72 }
  0x89   :  { %v92_v18 = vmul.f32 %v287_v9, %v78_v17  ;;  %v91_v25 = vmul.f32 %v287_v9, %v73_v19 }
  0x8b   :  { %v122_v21 = vadd.f32 %v112_v8, %v92_v18 }
  0x8c   :  { %v189_v47 = vpop.permute.xlu2 %188 }
  0x8d   :  { %v128_v22 = vmax.f32 %v122_v21, 0.0 }
  0x8f   :  { %157 = vmatpush.msra.mxu0 %v128_v22  ;;  %251 = vmatpush.msra.mxu1 %v128_v22 }
  0x90   :  { %252 = vmatpush.msra.mxu2 %v128_v22  ;;  %253 = vmatpush.msra.mxu3 %v128_v22  ;;  %v63_v27 = vpop.permute.xlu1 %62 }
  0x91   :  { %v108_v26 = vpop.permute.xlu0 %107  ;;  %v89_v30 = vmul.f32 %v287_v9, %v63_v27 }
  0x92   :  { %v121_v29 = vadd.f32 %v108_v26, %v91_v25 }
  0x93   :  { %v119_v33 = vadd.f32 %v100_v31, %v89_v30 }
  0x94   :  { %v127_v32 = vmax.f32 %v121_v29, 0.0  ;;  %v201_v62 = vpop.permute.xlu2 %200 }
  0x95   :  { %v125_v35 = vmax.f32 %v119_v33, 0.0 }
  0x96   :  { %158 = vmatpush.msra.mxu0 %v127_v32  ;;  %254 = vmatpush.msra.mxu1 %v127_v32 }
  0x97   :  { %255 = vmatpush.msra.mxu2 %v127_v32  ;;  %256 = vmatpush.msra.mxu3 %v127_v32 }
  0x98   :  { %159 = vmatpush.msra.mxu0 %v126_v34  ;;  %257 = vmatpush.msra.mxu1 %v126_v34  ;;  %v58_v36 = vpop.permute.xlu1 %57 }
  0x99   :  { %258 = vmatpush.msra.mxu2 %v126_v34  ;;  %259 = vmatpush.msra.mxu3 %v126_v34  ;;  %v88_v38 = vmul.f32 %v287_v9, %v58_v36  ;;  %v96_v39 = vpop.permute.xlu0 %95 }
  0x9a   :  { %160 = vmatpush.msra.mxu0 %v125_v35  ;;  %260 = vmatpush.msra.mxu1 %v125_v35 }
  0x9b   :  { %261 = vmatpush.msra.mxu2 %v125_v35  ;;  %262 = vmatpush.msra.mxu3 %v125_v35  ;;  %v118_v40 = vadd.f32 %v96_v39, %v88_v38 }
  0x9d   :  { %v124_v41 = vmax.f32 %v118_v40, 0.0 }
  0x9f   :  { %161 = vmatpush.msra.mxu0 %v124_v41  ;;  %263 = vmatpush.msra.mxu1 %v124_v41 }
  0xa0   :  { %264 = vmatpush.msra.mxu2 %v124_v41  ;;  %265 = vmatpush.msra.mxu3 %v124_v41 }
  0xa1   :  { %245 = vmatmul.msk.f32.vlgmr.msra.gmra.mxu2 %vm130_vm0, %v401_v5  ;;  %246 = vmatmul.msk.f32.vlgmr.msra.gmra.mxu3 %vm130_vm0, %v399_v4  ;;  %v185_v46 = vpop.permute.xlu1 %184 }
  0xa2   :  { %243 = vmatmul.msk.f32.vlgmr.msra.gmra.mxu0 %vm130_vm0, %v411_v7  ;;  %244 = vmatmul.msk.f32.vlgmr.msra.gmra.mxu1 %vm130_vm0, %v406_v6  ;;  %v193_v50 = vpop.permute.xlu0 %192 }
  0xa9   :  { %247 = vmatmul.msk.f32.gmra.mxu3 %vm130_vm0, %v396_v3  ;;  %v197_v58 = vpop.permute.xlu1 %196 }
  0xb2   :  { %v221_v7 = vpop.permute.xlu1 %220 }
 0x11f   :  { %v163_v42 = vpop.f32.mrf.mxu0  ;;  %v166_v43 = vpop.f32.mrf.mxu1 }
 0x120   :  { %v178_v44 = vmax.f32 %v163_v42, 0.0  ;;  %v179_v45 = vmax.f32 %v166_v43, 0.0 }
 0x122   :  { %v203_v48 = vmul.f32 %v185_v46, %v178_v44  ;;  %v204_v49 = vmul.f32 %v189_v47, %v179_v45 }
 0x124   :  { %v169_v51 = vpop.f32.mrf.mxu2  ;;  %v172_v52 = vpop.f32.mrf.mxu3  ;;  %v208_v54 = vadd.f32 %v204_v49, %v203_v48 }
 0x125   :  { %v180_v53 = vmax.f32 %v169_v51, 0.0  ;;  %v181_v56 = vmax.f32 %v172_v52, 0.0 }
 0x127   :  { %v205_v55 = vmul.f32 %v193_v50, %v180_v53  ;;  %v206_v60 = vmul.f32 %v197_v58, %v181_v56 }
 0x129   :  { %v209_v57 = vadd.f32 %v208_v54, %v205_v55 }
 0x12b   :  { %v210_v63 = vadd.f32 %v209_v57, %v206_v60 }
 0x12c   :  { %v175_v59 = vpop.f32.mrf.mxu3 }
 0x12d   :  { %v182_v61 = vmax.f32 %v175_v59, 0.0 }
 0x12f   :  { %v207_v0 = vmul.f32 %v201_v62, %v182_v61 }
 0x131   :  { %v211_v1 = vadd.f32 %v210_v63, %v207_v0 }
 0x133   :  { %v212_v2 = vrot.slane %v211_v1, 4 }
 0x135   :  { %v213_v3 = vadd.f32 %v212_v2, %v211_v1 }
 0x137   :  { %v214_v4 = vrot.slane %v213_v3, 2 }
 0x139   :  { %v215_v5 = vadd.f32 %v214_v4, %v213_v3 }
 0x13b   :  { %v216_v6 = vrot.slane %v215_v5, 1 }
 0x13d   :  { %v217_v8 = vadd.f32 %v216_v6, %v215_v5 }
 0x13f   :  { %v223_v9 = vadd.f32 %v221_v7, %v217_v8 }
 0x141   :  { %224 = vst [vmem:[#allocation7] sm:$0x1] %v223_v9 }
 0x142   :  { %235 = dma.vmem_to_hbm [thread:$0]  %s231_s1, 16, %s233_s23, [#allocation4]  }
 0x143   :  { %364 = dma.done.wait [#allocation4], 16  }
 0x144   :  { %365 = vsyncadd [#allocation4], 4294967280 }
 0x145   :  { %240 = vsyncpa [#allocation3], 1 }
 0x146   :  { %241 = vsyncpa [#allocation6], 1 }
 0x147   :  { %242 = vsyncpa [#allocation4], 1 }

</bundles_post_ra>
